<compile_context>
chip_gen: v7x
topology: tpu7x:2x2x1
jax: 0.10.0
libtpu: 0.0.40
codegen_flags: <defaults>
</compile_context>

<pallas_src>
from functools import reduce
from operator import mul

import jax
import jax.numpy as jnp
from jax.experimental import pallas as pl
from jax.experimental.pallas import tpu as pltpu


PACK = 8  # rows packed per lane-row (f32 sublane count)


def _round_up(n, m):
    return ((n + m - 1) // m) * m


def _cdiv(a, b):
    return -(-a // b)


# ----------------------------------------------------------------------------
# Pallas kernel: fused Linear -> ReLU -> Linear on the row-packed layout.
# ----------------------------------------------------------------------------
def _packed_mlp_kernel(x_ref, w1_ref, b1_ref, w2_ref, b2_ref, o_ref):
    # x_ref : (TR, PACK*D_in)        packed input tile (8 rows per lane-row)
    # w1_ref: (PACK*D_in, PACK*H)    block-diagonal kron(I8, W1), bf16, resident
    # b1_ref: (1, PACK*H)            epilogue dtype (f32 on v5e, bf16 on v6e/v7x)
    # w2_ref: (PACK*H, PACK*D_out)   block-diagonal kron(I8, W2), bf16, resident
    # b2_ref: (1, PACK*D_out)        f32
    # o_ref : (TR, PACK*D_out)       packed output tile (lane-dense, 128 lanes)
    w1 = w1_ref[...]
    w2 = w2_ref[...]
    b1 = b1_ref[...]
    x = x_ref[...].astype(w1.dtype)                       # in-kernel cast (cheap)
    h = jnp.dot(x, w1, preferred_element_type=jnp.float32)
    # Bias + ReLU in the bias dtype: bf16 on v6e/v7x (halves VALU instructions
    # on the 512-lane h stream; h must be cast to bf16 for the second matmul
    # anyway), f32 on v5e (no bf16 VPU path there).
    h = jnp.maximum(h.astype(b1.dtype) + b1, 0.0)
    y = jnp.dot(h.astype(w2.dtype), w2, preferred_element_type=jnp.float32)
    # Final bias add kept in f32: the output stream is only 128 lanes wide, so
    # this costs little and preserves the original numerics for the store.
    o_ref[...] = (y + b2_ref[...]).astype(o_ref.dtype)


# ----------------------------------------------------------------------------
# Tile selection with VMEM accounting
# ----------------------------------------------------------------------------
def _vmem_bytes_estimate(tile_rows, packed_in, packed_hid, packed_out):
    """Rough per-core VMEM footprint of one pipelined step."""
    io = 2 * tile_rows * (packed_in + packed_out) * 4          # double-buffered f32 in/out
    h = tile_rows * packed_hid * (4 + 2)                       # f32 h + its bf16 copy
    w = 2 * 2 * (packed_in * packed_hid + packed_hid * packed_out)  # bf16 weights, 2 bufs
    b = 2 * 2 * (packed_hid + packed_out) * 4                  # biases
    return io + h + w + b


def _choose_tile_rows(packed_rows, max_tile_rows, packed_in, packed_hid,
                      packed_out, *, min_tile_rows=512, target_steps=4,
                      vmem_budget=24 * 1024 * 1024):
    """Pick the packed-row tile.

    Aim for >= target_steps grid steps (>= 2 blocks per TensorCore on v7x so
    the software pipeline has interior blocks to hide DMA behind), but never
    shrink a tile below ~min_tile_rows packed rows (amortizes the ~0.35 us
    fixed per-step cost) unless the whole batch is smaller than that.  Shrink
    if the estimated VMEM footprint (incl. the f32 h intermediate) would not
    fit the scoped budget.
    """
    max_tile_rows = max(8, _round_up(max_tile_rows, 8))
    if packed_rows <= 8:
        return packed_rows                      # single full-extent block

    tile = _round_up(_cdiv(packed_rows, target_steps), 8)
    if tile < min_tile_rows:
        # Batch too small for target_steps big tiles: prefer >=512-row tiles,
        # falling back to a >=2-step split of whatever batch we have.
        tile = min(min_tile_rows, _round_up(_cdiv(packed_rows, 2), 8))
    tile = min(tile, max_tile_rows, _round_up(packed_rows, 8))

    while tile > 8 and _vmem_bytes_estimate(tile, packed_in, packed_hid,
                                            packed_out) > vmem_budget:
        tile = max(8, _round_up(tile // 2, 8))
    return max(tile, 8)


# ----------------------------------------------------------------------------
# Wrapper around pallas_call
# ----------------------------------------------------------------------------
def _mlp_pallas(x2d, w1_blk, b1_t, w2_blk, b2_t, *, d_in, d_out,
                max_tile_rows=1024):
    """x2d: (B, d_in) -> (B, d_out) via the fused, row-packed Pallas MLP.

    max_tile_rows=1024 packed rows == 8192 original batch rows per grid step
    (~1 MiB f32 input tile / 0.5 MiB output tile).  Values up to 2048 are
    allowed and still fit comfortably inside the 32 MiB scoped VMEM limit
    (valid on every generation including v7x's 64 MiB physical VMEM)."""
    B = x2d.shape[0]
    assert x2d.shape[1] == d_in
    max_tile_rows = min(max_tile_rows, 2048)

    # Pad only to the 8-row packing factor (<= 7 rows) — NOT to the batch tile
    # (Pallas masks the partial last block).
    padded_b = _round_up(B, PACK)
    if padded_b != B:
        x2d = jnp.pad(x2d, ((0, padded_b - B), (0, 0)))
    packed_rows = padded_b // PACK

    # Free, contiguous row-major reshape: 8 rows -> 1 lane-dense packed row.
    xp = x2d.reshape(packed_rows, PACK * d_in)

    packed_in = PACK * d_in
    packed_hid = w1_blk.shape[1]
    packed_out = PACK * d_out

    tile_rows = _choose_tile_rows(packed_rows, max_tile_rows,
                                  packed_in, packed_hid, packed_out)
    grid = (_cdiv(packed_rows, tile_rows),)

    out_dtype = x2d.dtype
    # FLOPs of the packed (block-diagonal) matmuls actually executed (8x the
    # mathematical FLOPs) so XLA's scheduler sees the real MXU cost.
    flops = 2 * packed_rows * (packed_in * packed_hid + packed_hid * packed_out)
    bytes_accessed = int(
        xp.size * xp.dtype.itemsize
        + packed_rows * packed_out * jnp.dtype(out_dtype).itemsize
        + w1_blk.size * w1_blk.dtype.itemsize
        + w2_blk.size * w2_blk.dtype.itemsize
        + b1_t.size * b1_t.dtype.itemsize
        + b2_t.size * b2_t.dtype.itemsize)

    # NOTE: the four constant-index-map weight/bias blocks are only DMA'd once
    # per call; their default double-buffering costs < 0.5 MiB, well inside the
    # VMEM budget above, so they are left at the default buffering.
    out = pl.pallas_call(
        _packed_mlp_kernel,
        out_shape=jax.ShapeDtypeStruct((packed_rows, packed_out), out_dtype),
        grid_spec=pltpu.PrefetchScalarGridSpec(
            num_scalar_prefetch=0,
            grid=grid,
            in_specs=[
                pl.BlockSpec((tile_rows, packed_in), lambda i: (i, 0)),   # x tile
                pl.BlockSpec((packed_in, packed_hid), lambda i: (0, 0)),  # W1 blk
                pl.BlockSpec((1, packed_hid), lambda i: (0, 0)),          # b1
                pl.BlockSpec((packed_hid, packed_out), lambda i: (0, 0)), # W2 blk
                pl.BlockSpec((1, packed_out), lambda i: (0, 0)),          # b2
            ],
            out_specs=pl.BlockSpec((tile_rows, packed_out), lambda i: (i, 0)),
        ),
        compiler_params=pltpu.CompilerParams(
            dimension_semantics=("parallel",),
            vmem_limit_bytes=32 * 1024 * 1024),
        cost_estimate=pl.CostEstimate(flops=flops, transcendentals=0,
                                      bytes_accessed=bytes_accessed),
    )(xp, w1_blk, b1_t, w2_blk, b2_t)

    # Free contiguous un-pack, then drop the (<=7) pad rows.
    return out.reshape(padded_b, d_out)[:B]


# ----------------------------------------------------------------------------
# Parameter packing: block-diagonal weights for the row-packed layout.
# ----------------------------------------------------------------------------
def pack_params(w1, b1, w2, b2, compute_dtype=jnp.bfloat16,
                epilogue_dtype=jnp.float32):
    """(d_in,h),(h,),(h,d_out),(d_out,) -> packed kernel params."""
    eye = jnp.eye(PACK, dtype=jnp.float32)
    w1_blk = jnp.kron(eye, w1.astype(jnp.float32)).astype(compute_dtype)
    w2_blk = jnp.kron(eye, w2.astype(jnp.float32)).astype(compute_dtype)
    b1_t = jnp.tile(b1.reshape(1, -1).astype(epilogue_dtype), (1, PACK))
    b2_t = jnp.tile(b2.reshape(1, -1).astype(jnp.float32), (1, PACK))
    return w1_blk, b1_t, w2_blk, b2_t


def _default_epilogue_dtype():
    """bf16 bias+ReLU on chips with a bf16 VPU (v6e / v7x); f32 elsewhere."""
    try:
        kind = jax.devices()[0].device_kind.lower()
    except Exception:
        return jnp.float32
    if any(tag in kind for tag in ("v6", "v7", "tpu7")):
        return jnp.bfloat16
    return jnp.float32


# ----------------------------------------------------------------------------
# LayeredModel equivalent
# ----------------------------------------------------------------------------
class LayeredModelPallas:
    """JAX/Pallas port of LayeredModel instantiated with
    [Linear(32,64), ReLU(), Linear(64,16)].

    # TODO(synk): freeze()/unfreeze()/named_parameters()/children() are PyTorch
    # autograd / module bookkeeping with no kernel-side equivalent; omitted.
    """

    def __init__(self, input_shape, output_shape, raw_params,
                 compute_dtype=jnp.bfloat16, epilogue_dtype=None):
        self._input_shape = tuple(input_shape)
        self._output_shape = tuple(output_shape)
        self.raw_params = raw_params                   # (w1, b1, w2, b2) f32
        w1, b1, w2, b2 = raw_params
        self._d_in = w1.shape[0]
        self._d_out = w2.shape[1]
        self.epilogue_dtype = (epilogue_dtype if epilogue_dtype is not None
                               else _default_epilogue_dtype())
        self.packed_params = pack_params(w1, b1, w2, b2, compute_dtype,
                                         self.epilogue_dtype)

    @property
    def input_shape(self):
        return self._input_shape

    @property
    def input_ndim(self):
        return len(self._input_shape)

    @property
    def input_numel(self):
        return reduce(mul, self._input_shape, 1)

    @property
    def output_shape(self):
        return self._output_shape

    @property
    def output_ndim(self):
        return len(self._output_shape)

    @property
    def output_numel(self):
        return reduce(mul, self._output_shape, 1)

    def forward(self, *inputs):
        assert len(inputs) == 1
        x = inputs[0]
        assert x.ndim >= self.input_ndim
        assert tuple(x.shape[-self.input_ndim:]) == self.input_shape

        lead = x.shape[:-self.input_ndim]
        x2d = x.reshape((-1, self.input_numel))        # flatten leading dims
        w1_blk, b1_t, w2_blk, b2_t = self.packed_params
        y2d = _mlp_pallas(x2d, w1_blk, b1_t, w2_blk, b2_t,
                          d_in=self._d_in, d_out=self._d_out)
        return y2d.reshape(lead + self.output_shape)

    __call__ = forward


# ----------------------------------------------------------------------------
# Deterministic parameter init (mimics nn.Linear default U(-1/sqrt(fan_in),.))
# ----------------------------------------------------------------------------
def init_params(key, d_in, hidden, d_out, dtype=jnp.float32):
    k1, k2, k3, k4 = jax.random.split(key, 4)
    bound1 = 1.0 / (d_in ** 0.5)
    bound2 = 1.0 / (hidden ** 0.5)
    # Stored (in, out) for the kernel's x @ W layout.
    w1 = jax.random.uniform(k1, (d_in, hidden), dtype, -bound1, bound1)
    b1 = jax.random.uniform(k2, (hidden,), dtype, -bound1, bound1)
    w2 = jax.random.uniform(k3, (hidden, d_out), dtype, -bound2, bound2)
    b2 = jax.random.uniform(k4, (d_out,), dtype, -bound2, bound2)
    return w1, b1, w2, b2


def _ref_forward(x2d, raw_params, epilogue_dtype=jnp.float32):
    """Pure-JAX reference mirroring the kernel's bf16-operand / f32-accum math
    and the selected (f32 or bf16) bias+ReLU epilogue."""
    w1, b1, w2, b2 = raw_params
    f32, bf16 = jnp.float32, jnp.bfloat16
    xc = x2d.astype(bf16).astype(f32)
    w1c = w1.astype(bf16).astype(f32)
    w2c = w2.astype(bf16).astype(f32)
    h = xc @ w1c
    if epilogue_dtype == jnp.bfloat16:
        hb = jnp.maximum(h.astype(bf16) + b1.astype(bf16).reshape(1, -1), 0.0)
        hc = hb.astype(f32)
    else:
        hc = jnp.maximum(h + b1.reshape(1, -1), 0.0).astype(bf16).astype(f32)
    return hc @ w2c + b2.reshape(1, -1)


if __name__ == "__main__":
    D_IN, HIDDEN, D_OUT = 32, 64, 16

    key = jax.random.PRNGKey(0)
    pkey, xkey1, xkey2 = jax.random.split(key, 3)
    raw_params = init_params(pkey, D_IN, HIDDEN, D_OUT)

    model = LayeredModelPallas(input_shape=(D_IN,), output_shape=(D_OUT,),
                               raw_params=raw_params)
    # Tolerance: the bf16 bias+ReLU epilogue (v6e/v7x) rounds h before the
    # bias add, so allow a couple of bf16 ulps; the f32 path matches tightly.
    bf16_epi = (model.epilogue_dtype == jnp.bfloat16)
    tol = 2e-2 if bf16_epi else 1e-3

    # Case 1: extra leading dims (LayeredModel accepts ndim >= input_ndim);
    # 4*50 = 200 rows -> multi-step grid, lane-dense packed I/O, no pad needed.
    x1 = jax.random.normal(xkey1, (4, 50, D_IN), jnp.float32)
    y1 = jax.block_until_ready(model(x1))
    assert y1.shape == (4, 50, D_OUT), y1.shape
    y1_ref = _ref_forward(x1.reshape(-1, D_IN), raw_params,
                          model.epilogue_dtype).reshape(4, 50, D_OUT)
    assert jnp.allclose(y1, y1_ref, atol=tol, rtol=tol)

    # Case 2: tiny batch=2 (exercises the <=7-row packing pad + partial tile).
    x2 = jax.random.normal(xkey2, (2, D_IN), jnp.float32)
    y2 = jax.block_until_ready(model(x2))
    assert y2.shape == (2, D_OUT), y2.shape
    y2_ref = _ref_forward(x2, raw_params, model.epilogue_dtype)
    assert jnp.allclose(y2, y2_ref, atol=tol, rtol=tol)

    print("KERNEL_OK")
</pallas_src>

<mosaic_0001>
module attributes {stable_mosaic.version = 11 : i64} {
  func.func @_packed_mlp_kernel(%arg0: i32, %arg1: memref<16x256xf32, #tpu.memory_space<vmem>>, %arg2: memref<256x512xbf16, #tpu.memory_space<vmem>>, %arg3: memref<1x512xf32, #tpu.memory_space<vmem>>, %arg4: memref<512x128xbf16, #tpu.memory_space<vmem>>, %arg5: memref<1x128xf32, #tpu.memory_space<vmem>>, %arg6: memref<16x128xf32, #tpu.memory_space<vmem>>) attributes {dimension_semantics = [#tpu.dimension_semantics<parallel>], iteration_bounds = array<i64: 2>, scalar_prefetch = 0 : i64, scratch_operands = 0 : i64, tpu.core_type = #tpu.core_type<tc>, window_params = [{transform_indices = @transform_0, window_bounds = array<i64: 16, 256>}, {pipeline_mode = #tpu.pipeline_mode<synchronous>, transform_indices = @transform_1, window_bounds = array<i64: 256, 512>}, {pipeline_mode = #tpu.pipeline_mode<synchronous>, transform_indices = @transform_2, window_bounds = array<i64: 1, 512>}, {pipeline_mode = #tpu.pipeline_mode<synchronous>, transform_indices = @transform_3, window_bounds = array<i64: 512, 128>}, {pipeline_mode = #tpu.pipeline_mode<synchronous>, transform_indices = @transform_4, window_bounds = array<i64: 1, 128>}, {transform_indices = @transform_5, window_bounds = array<i64: 16, 128>}]} {
    %c0 = arith.constant 0 : index
    %c0_0 = arith.constant 0 : index
    %0 = vector.load %arg2[%c0, %c0_0] : memref<256x512xbf16, #tpu.memory_space<vmem>>, vector<256x512xbf16>
    %c0_1 = arith.constant 0 : index
    %c0_2 = arith.constant 0 : index
    %1 = vector.load %arg4[%c0_1, %c0_2] : memref<512x128xbf16, #tpu.memory_space<vmem>>, vector<512x128xbf16>
    %c0_3 = arith.constant 0 : index
    %c0_4 = arith.constant 0 : index
    %2 = vector.load %arg3[%c0_3, %c0_4] : memref<1x512xf32, #tpu.memory_space<vmem>>, vector<1x512xf32>
    %c0_5 = arith.constant 0 : index
    %c0_6 = arith.constant 0 : index
    %3 = vector.load %arg1[%c0_5, %c0_6] : memref<16x256xf32, #tpu.memory_space<vmem>>, vector<16x256xf32>
    %4 = arith.truncf %3 : vector<16x256xf32> to vector<16x256xbf16>
    %cst = arith.constant dense<0.000000e+00> : vector<16x512xf32>
    %5 = tpu.matmul %4, %0, %cst {dimension_numbers = #tpu.dot_dimension_numbers<[1], [0], [0], [1], [0, 0, 1, 1], [], []>} : vector<16x256xbf16>, vector<256x512xbf16>, vector<16x512xf32> -> vector<16x512xf32>
    %6 = vector.broadcast %2 : vector<1x512xf32> to vector<16x512xf32>
    %7 = arith.addf %5, %6 : vector<16x512xf32>
    %cst_7 = arith.constant 0.000000e+00 : f32
    %8 = vector.broadcast %cst_7 : f32 to vector<16x512xf32>
    %9 = arith.maximumf %7, %8 : vector<16x512xf32>
    %10 = arith.truncf %9 : vector<16x512xf32> to vector<16x512xbf16>
    %cst_8 = arith.constant dense<0.000000e+00> : vector<16x128xf32>
    %11 = tpu.matmul %10, %1, %cst_8 {dimension_numbers = #tpu.dot_dimension_numbers<[1], [0], [0], [1], [0, 0, 1, 1], [], []>} : vector<16x512xbf16>, vector<512x128xbf16>, vector<16x128xf32> -> vector<16x128xf32>
    %c0_9 = arith.constant 0 : index
    %c0_10 = arith.constant 0 : index
    %12 = vector.load %arg5[%c0_9, %c0_10] : memref<1x128xf32, #tpu.memory_space<vmem>>, vector<1x128xf32>
    %13 = vector.broadcast %12 : vector<1x128xf32> to vector<16x128xf32>
    %14 = arith.addf %11, %13 : vector<16x128xf32>
    %c0_11 = arith.constant 0 : index
    %c0_12 = arith.constant 0 : index
    %15 = vector.load %arg6[%c0_11, %c0_12] : memref<16x128xf32, #tpu.memory_space<vmem>>, vector<16x128xf32>
    tpu.vector_store %arg6[%c0_11, %c0_12], %14 {strides = array<i32>} : memref<16x128xf32, #tpu.memory_space<vmem>>, vector<16x128xf32>,
    return
  }
  func.func @transform_0(%arg0: i32) -> (i32, i32) {
    %c0_i32 = arith.constant 0 : i32
    %c0_i32_0 = arith.constant 0 : i32
    return %arg0, %c0_i32 : i32, i32
  }
  func.func @transform_1(%arg0: i32) -> (i32, i32) {
    %c0_i32 = arith.constant 0 : i32
    %c0_i32_0 = arith.constant 0 : i32
    %c0_i32_1 = arith.constant 0 : i32
    return %c0_i32, %c0_i32_0 : i32, i32
  }
  func.func @transform_2(%arg0: i32) -> (i32, i32) {
    %c0_i32 = arith.constant 0 : i32
    %c0_i32_0 = arith.constant 0 : i32
    %c0_i32_1 = arith.constant 0 : i32
    return %c0_i32, %c0_i32_0 : i32, i32
  }
  func.func @transform_3(%arg0: i32) -> (i32, i32) {
    %c0_i32 = arith.constant 0 : i32
    %c0_i32_0 = arith.constant 0 : i32
    %c0_i32_1 = arith.constant 0 : i32
    return %c0_i32, %c0_i32_0 : i32, i32
  }
  func.func @transform_4(%arg0: i32) -> (i32, i32) {
    %c0_i32 = arith.constant 0 : i32
    %c0_i32_0 = arith.constant 0 : i32
    %c0_i32_1 = arith.constant 0 : i32
    return %c0_i32, %c0_i32_0 : i32, i32
  }
  func.func @transform_5(%arg0: i32) -> (i32, i32) {
    %c0_i32 = arith.constant 0 : i32
    %c0_i32_0 = arith.constant 0 : i32
    return %arg0, %c0_i32 : i32, i32
  }
}

</mosaic_0001>

<bundles_post_ra>
// kernel: tpu_custom_call.1
= control target key start
LH: loop header
LB: loop body
LE: loop exit
PB: predicated region body
PF: predicated region fallthrough
CT: control target
= control target key end

     0   :  { %10 = vsyncpa [#allocation3], 0  ;;  %s2054_s0 = inlined_call_operand.hbm [shape: f32[25,256], index: 0, kind: input, shape index: {}]   ;;  %s2055_s1 = inlined_call_operand.hbm [shape: bf16[256,512], index: 1, kind: input, shape index: {}]   ;;  %s2056_s2 = inlined_call_operand.vmem [shape: f32[1,512], index: 2, kind: input, shape index: {}]   ;;  %s2057_s3 = inlined_call_operand.hbm [shape: bf16[512,128], index: 3, kind: input, shape index: {}]   ;;  %s2058_s4 = inlined_call_operand.vmem [shape: f32[1,128], index: 4, kind: input, shape index: {}]   ;;  %s2059_s5 = inlined_call_operand.hbm [shape: f32[25,128], index: 5, kind: output, shape index: {}]  }
   0x1   :  { %12 = vsyncpa [#allocation3 + $0x1], 0 }
   0x2   :  { %13 = vsyncpa [#allocation6], 0 }
   0x3   :  { %14 = vsyncpa [#allocation4], 0 }
   0x4   :  { %16 = vsyncpa [#allocation4 + $0x1], 0  ;;  %s1801_s18 = smov 0   ;;  %s1803_s19 = smov 0  }
   0x5   :  { %s1805_s20 = smov 0   ;;  %s1807_s21 = smov 0  }
   0x6 LB: > { %s1822_s22 = sadd.s32 4294967295, %s1759_s21   ;;  %s1239_s23 = sadd.s32 4294967294, %s1759_s21   ;;  %s1759_s21 = sphi %s1807_s21, %s2079_s21   ;;  %s1755_s20 = sphi %s1805_s20, %s2078_s20   ;;  %s1751_s19 = sphi %s1803_s19, %s2077_s19   ;;  %s1747_s18 = sphi %s1801_s18, %s2076_s18  }
   0x7   : > { %p42_p0 = scmp.ne.s32.totalorder %s1751_s19, %s1747_s18  ;;  %p2060_p1 = scmp.eq.s32.totalorder %s1822_s22, 0 }
   0x8   : > { %p156_p3 = scmp.eq.s32.totalorder %s1239_s23, 1  ;;  %p1240_p5 = scmp.ge.s32.totalorder %s1759_s21, 1 }
   0x9   : > { %p1831_p4 = por %p2060_p1, %p42_p0  ;;  %p163_p7 = scmp.lt.s32.totalorder %s1759_s21, 3 }
   0xa   : > { %p1836_p6 = por %p156_p3, %p42_p0  ;;  %s1761_s27 = smov [#allocation5]  }
   0xb   : > { %s2063_s24 = scalar_select %p1831_p4, 1, 0 }
   0xc   : > { %s2064_s25 = scalar_select %p1836_p6, 1, 0 }
   0xd   : > { %p1841_p8 = pnand %p1240_p5, %p163_p7  ;;  %s175_s28 = sshll.u32 %s1761_s27, 4  ;;  %s1845_s28 = int_to_ptr.vmem [resolvable:$true] %s175_s28 }
   0xe   : > { %s1762_s30 = smov [#allocation7]   ;;  %s1603_s9 = scalar_lea.hbm %s2055_s1, 8192 }
   0xf   : > { %p1414_p9 = pneg %p1841_p8  ;;  %s191_s6 = sshll.u32 %s1762_s30, 4  ;;  %s1856_s6 = int_to_ptr.vmem [resolvable:$true] %s191_s6 }
  0x10   : > { %p1604_p12 = scmp.ne.s32.totalorder %s2055_s1, %s1603_s9  ;;  %p1610_p5 = scmp.lt.u32.totalorder %s1603_s9, %s2055_s1 }
  0x11   : > { %p1852_p11 = pnand %p1414_p9, %p2060_p1 }
  0x13   : > { %p1605_p13 = pneg %p1852_p11 }
  0x15   : > { %p1606_p0 = pnand %p1605_p13, %p1604_p12 }
  0x17   : > { %p1607_p3 = pneg %p1606_p0 }
  0x19   : > { %p1612_p7 = pnand %p1610_p5, %p1607_p3 }
  0x1b   : > { %1615 = shalt.err (!%p1612_p7)
}
  0x1c   : > { %s1616_s14 = scalar_lea.vmem %s1845_s28, 8192  ;;  %p1624_p2 = scmp.lt.s32.totalorder %s1845_s28, %s1845_s28 }
  0x1d   : > { %p1617_p9 = scmp.ne.s32.totalorder %s1845_s28, %s1616_s14  ;;  %p1625_p12 = scmp.lt.s32.totalorder %s1616_s14, %s1616_s14 }
  0x1f   : > { %p1619_p10 = pnand %p1617_p9, %p1605_p13  ;;  %p1626_p0 = por %p1625_p12, %p1624_p2 }
  0x21   : > { %p1620_p1 = pneg %p1619_p10 }
  0x23   : > { %p1627_p6 = pnand %p1626_p0, %p1620_p1 }
  0x25   : > { %1630 = shalt.err (!%p1627_p6)
}
  0x26   : > { %s1763_s15 = smov 256   ;;  %s1764_s16 = smov 16  }
  0x27   : > { %1417 = dma.hbm_to_vmem [thread:$0]  (!%p1852_p11), %s2055_s1, 8192, %s1845_s28, [#allocation6], %s1763_s15, %s1763_s15, %s1764_s16  }
  0x28   : > { %s1631_s7 = scalar_lea.hbm %s2057_s3, 4096 }
  0x29   : > { %p1632_p1 = scmp.ne.s32.totalorder %s2057_s3, %s1631_s7  ;;  %p1638_p10 = scmp.lt.u32.totalorder %s1631_s7, %s2057_s3 }
  0x2b   : > { %p1634_p2 = pnand %p1632_p1, %p1605_p13 }
  0x2d   : > { %p1635_p6 = pneg %p1634_p2 }
  0x2f   : > { %p1640_p3 = pnand %p1638_p10, %p1635_p6 }
  0x31   : > { %1643 = shalt.err (!%p1640_p3)
}
  0x32   : > { %s1644_s28 = scalar_lea.vmem %s1856_s6, 4096  ;;  %p1652_p12 = scmp.lt.s32.totalorder %s1856_s6, %s1856_s6 }
  0x33   : > { %p1645_p5 = scmp.ne.s32.totalorder %s1856_s6, %s1644_s28  ;;  %p1653_p0 = scmp.lt.s32.totalorder %s1644_s28, %s1644_s28 }
  0x35   : > { %p1647_p7 = pnand %p1645_p5, %p1605_p13  ;;  %p1654_p1 = por %p1653_p0, %p1652_p12 }
  0x37   : > { %p1648_p9 = pneg %p1647_p7 }
  0x39   : > { %p1655_p2 = pnand %p1654_p1, %p1648_p9 }
  0x3b   : > { %1658 = shalt.err (!%p1655_p2)
}
  0x3c   : > { %s1765_s12 = smov 64   ;;  %s1766_s13 = smov 4  }
  0x3d   : > { %1420 = dma.hbm_to_vmem [thread:$0]  (!%p1852_p11), %s2057_s3, 4096, %s1856_s6, [#allocation6], %s1765_s12, %s1765_s12, %s1766_s13  }
  0x3e   : > { %s1914_s23 = sadd.s32 1, %s1759_s21   ;;  %s29_s30 = sadd.s32 1, %s1755_s20 }
  0x3f   : > { %s26_s27 = ssub.s32 %s1759_s21, %s1914_s23  ;;  %p36_p6 = scmp.ne.s32.totalorder %s1755_s20, %s1751_s19 }
  0x40   : > { %p27_p13 = scmp.eq.s32.totalorder %s26_s27, 0  ;;  %p37_p10 = scmp.eq.s32.totalorder %s1759_s21, 0 }
  0x41   : > { %p2067_p5 = scmp.eq.s32.totalorder %s1822_s22, 1  ;;  %p1431_p9 = scmp.lt.s32.totalorder %s1759_s21, 2 }
  0x42   : > { %s1923_s7 = scalar_select %p27_p13, %s1755_s20, %s29_s30  }
  0x43   : > { %p38_p3 = por %p37_p10, %p36_p6  ;;  %p1927_p7 = por %p2067_p5, %p36_p6 }
  0x44   : > { %s208_s29 = sand.u32 1, %s1755_s20   ;;  %s1356_s6 = sshll.u32 %s1759_s21, 9 }
  0x45   : > { %s2068_s8 = scalar_select %p1927_p7, 1, 0 }
  0x46   : > { %s1244_s9 = sshll.u32 %s208_s29, 5  ;;  %s1937_s28 = scalar_lea.hbm %s2054_s0, %s1356_s6 }
  0x47   : > { %s212_s12 = scalar_lea.vmem [#allocation2], %s1244_s9  ;;  %p1941_p11 = pnand %p1431_p9, %p38_p3 }
  0x48   : > { %s220_s13 = sshll.u32 %s212_s12, 4  ;;  %s1945_s17 = scalar_lea.sflag [#allocation3], %s208_s29  ;;  %s1939_s13 = int_to_ptr.vmem [resolvable:$true] %s220_s13 }
  0x49   : > { %s1659_s27 = scalar_lea.hbm %s1937_s28, 512  ;;  %p1661_p0 = pneg %p1941_p11 }
  0x4a   : > { %p1660_p12 = scmp.ne.s32.totalorder %s1937_s28, %s1659_s27  ;;  %s1664_s6 = scalar_lea.hbm %s2054_s0, 1024 }
  0x4b   : > { %p1665_p13 = scmp.lt.u32.totalorder %s1937_s28, %s2054_s0  ;;  %p1666_p6 = scmp.lt.u32.totalorder %s1664_s6, %s1659_s27 }
  0x4c   : > { %p1662_p1 = pnand %p1661_p0, %p1660_p12  ;;  %p1668_p3 = scmp.lt.u32.totalorder %s1659_s27, %s1937_s28 }
  0x4d   : > { %p1667_p10 = por %p1666_p6, %p1665_p13 }
  0x4e   : > { %p1663_p2 = pneg %p1662_p1 }
  0x4f   : > { %p1669_p5 = por %p1668_p3, %p1667_p10 }
  0x51   : > { %p1670_p9 = pnand %p1669_p5, %p1663_p2 }
  0x53   : > { %1673 = shalt.err (!%p1670_p9)
}
  0x54   : > { %s1674_s29 = scalar_lea.vmem %s1939_s13, 512  ;;  %s1767_s12 = smov [#allocation2]  }
  0x55   : > { %p1675_p12 = scmp.ne.s32.totalorder %s1939_s13, %s1674_s29  ;;  %s1679_s30 = sshll.u32 %s1767_s12, 4  ;;  %s1680_s30 = int_to_ptr.vmem [resolvable:$false] %s1679_s30 }
  0x56   : > { %s1681_s9 = scalar_lea.vmem %s1680_s30, 1024  ;;  %p1682_p4 = scmp.lt.s32.totalorder %s1939_s13, %s1680_s30 }
  0x57   : > { %p1677_p1 = pnand %p1675_p12, %p1661_p0  ;;  %p1683_p13 = scmp.lt.s32.totalorder %s1681_s9, %s1674_s29 }
  0x59   : > { %p1678_p7 = pneg %p1677_p1  ;;  %p1684_p6 = por %p1683_p13, %p1682_p4 }
  0x5b   : > { %p1685_p10 = pnand %p1684_p6, %p1678_p7 }
  0x5d   : > { %1688 = shalt.err (!%p1685_p10)
}
  0x5e   : > { %1424 = dma.hbm_to_vmem [thread:$0]  (!%p1941_p11), %s1937_s28, 512, %s1939_s13, %s1945_s17, %s1763_s15, %s1763_s15, %s1764_s16  }
  0x5f   : > { %232 = sbr.rel (%p1841_p8) target bundleno = 629 (0x275), region = 40  ;;  %s1979_s27 = sand.u32 (!%p1841_p8), 1, %s1751_s19  }
  0x60   : > { %s1249_s6 = sshll.u32 (!%p1841_p8), %s1979_s27, 5  ;;  %s235_s10 = scalar_lea.sflag (!%p1841_p8), [#allocation3], %s1979_s27 }
  0x61   : > { %s1983_s11 = scalar_lea.vmem (!%p1841_p8), [#allocation2], %s1249_s6  ;;  %p2070_p4 = scmp.ne.s32.totalorder (!%p1841_p8), %s2063_s24, 0 }
  0x66   : > { %1734 = dma.done.wait (%p2070_p4), %s235_s10, 512  }
  0x67   : > { %1736 = vsyncadd (%p2070_p4), %s235_s10, 4294966784  ;;  %p2071_p7 = scmp.eq.s32.totalorder %s1822_s22, 0 }
  0x69   : > { %1738 = dma.done.wait (%p2071_p7), [#allocation6], 12288   ;;  %p2072_p8 = pmov %p2071_p7 }
  0x6a   : > { %v1475_v0 = vld [vmem:[#allocation5 + $0x4] ss:$16 sps:$4 sm:$0xff]   ;;  %v1477_v1 = vld [vmem:[#allocation5 + $0xc] ss:$16 sps:$4 sm:$0xff]   ;;  %v1479_v2 = vld [vmem:[#allocation5] ss:$16 sps:$4 sm:$0xff]  }
  0x6b   : > { %1740 = vsyncadd (%p2072_p8), [#allocation6], 4294955008  ;;  %752 = vmatprep.subr.bf16.mxu0 %v1475_v0  ;;  %v1480_v3 = vld [vmem:[#allocation5 + $0x8] ss:$16 sps:$4 sm:$0xff]   ;;  %795 = vmatprep.subr.bf16.mxu1 %v1477_v1  ;;  %v1481_v4 = vld [vmem:[#allocation5 + $0x24] ss:$16 sps:$4 sm:$0xff]  }
  0x6c   : > { %753 = vmatpush1.bf16.msra.mxu0 %v1479_v2  ;;  %796 = vmatpush1.bf16.msra.mxu1 %v1480_v3  ;;  %v1483_v5 = vld [vmem:[#allocation5 + $0x2c] ss:$16 sps:$4 sm:$0xff]   ;;  %v1485_v6 = vld [vmem:[#allocation5 + $0x20] ss:$16 sps:$4 sm:$0xff]   ;;  %v1486_v7 = vld [vmem:[#allocation5 + $0x28] ss:$16 sps:$4 sm:$0xff]  }
  0x6d   : > { %754 = vmatprep.subr.bf16.mxu0 %v1481_v4  ;;  %797 = vmatprep.subr.bf16.mxu1 %v1483_v5  ;;  %v1487_v8 = vld [vmem:[#allocation5 + $0x44] ss:$16 sps:$4 sm:$0xff]   ;;  %v1489_v9 = vld [vmem:[#allocation5 + $0x4c] ss:$16 sps:$4 sm:$0xff]   ;;  %v1491_v10 = vld [vmem:[#allocation5 + $0x40] ss:$16 sps:$4 sm:$0xff]  }
  0x6e   : > { %v1492_v11 = vld [vmem:[#allocation5 + $0x48] ss:$16 sps:$4 sm:$0xff]   ;;  %v1493_v12 = vld [vmem:[#allocation5 + $0x64] ss:$16 sps:$4 sm:$0xff]   ;;  %v1495_v13 = vld [vmem:[#allocation5 + $0x6c] ss:$16 sps:$4 sm:$0xff]  }
  0x6f   : > { %v1497_v14 = vld [vmem:[#allocation5 + $0x60] ss:$16 sps:$4 sm:$0xff]   ;;  %v1498_v15 = vld [vmem:[#allocation5 + $0x68] ss:$16 sps:$4 sm:$0xff]   ;;  %v1499_v16 = vld [vmem:[#allocation5 + $0x84] ss:$16 sps:$4 sm:$0xff]  }
  0x70   : > { %755 = vmatpush1.bf16.msra.mxu0 %v1485_v6  ;;  %798 = vmatpush1.bf16.msra.mxu1 %v1486_v7  ;;  %v1501_v17 = vld [vmem:[#allocation5 + $0x8c] ss:$16 sps:$4 sm:$0xff]   ;;  %v1503_v18 = vld [vmem:[#allocation5 + $0x80] ss:$16 sps:$4 sm:$0xff]   ;;  %v1504_v19 = vld [vmem:[#allocation5 + $0x88] ss:$16 sps:$4 sm:$0xff]  }
  0x71   : > { %756 = vmatprep.subr.bf16.mxu0 %v1487_v8  ;;  %799 = vmatprep.subr.bf16.mxu1 %v1489_v9  ;;  %v1505_v20 = vld [vmem:[#allocation5 + $0xa4] ss:$16 sps:$4 sm:$0xff]   ;;  %v1507_v21 = vld [vmem:[#allocation5 + $0xac] ss:$16 sps:$4 sm:$0xff]   ;;  %v1509_v22 = vld [vmem:[#allocation5 + $0xa0] ss:$16 sps:$4 sm:$0xff]  }
  0x72   : > { %v1510_v23 = vld [vmem:[#allocation5 + $0xa8] ss:$16 sps:$4 sm:$0xff]   ;;  %v1511_v24 = vld [vmem:[#allocation5 + $0xc4] ss:$16 sps:$4 sm:$0xff]   ;;  %v1513_v25 = vld [vmem:[#allocation5 + $0xcc] ss:$16 sps:$4 sm:$0xff]  }
  0x73   : > { %v1515_v26 = vld [vmem:[#allocation5 + $0xc0] ss:$16 sps:$4 sm:$0xff]   ;;  %v1516_v27 = vld [vmem:[#allocation5 + $0xc8] ss:$16 sps:$4 sm:$0xff]   ;;  %v1517_v28 = vld [vmem:[#allocation5 + $0xe4] ss:$16 sps:$4 sm:$0xff]  }
  0x74   : > { %757 = vmatpush1.bf16.msra.mxu0 %v1491_v10  ;;  %800 = vmatpush1.bf16.msra.mxu1 %v1492_v11  ;;  %v1519_v29 = vld [vmem:[#allocation5 + $0xec] ss:$16 sps:$4 sm:$0xff]   ;;  %v1521_v30 = vld [vmem:[#allocation5 + $0xe0] ss:$16 sps:$4 sm:$0xff]   ;;  %v1522_v31 = vld [vmem:[#allocation5 + $0xe8] ss:$16 sps:$4 sm:$0xff]  }
  0x75   : > { %758 = vmatprep.subr.bf16.mxu0 %v1493_v12  ;;  %801 = vmatprep.subr.bf16.mxu1 %v1495_v13  ;;  %v1523_v32 = vld [vmem:[#allocation5 + $0x104] ss:$16 sps:$4 sm:$0xff]   ;;  %v1525_v33 = vld [vmem:[#allocation5 + $0x10c] ss:$16 sps:$4 sm:$0xff]   ;;  %v1527_v34 = vld [vmem:[#allocation5 + $0x100] ss:$16 sps:$4 sm:$0xff]  }
  0x76   : > { %v1528_v35 = vld [vmem:[#allocation5 + $0x108] ss:$16 sps:$4 sm:$0xff]   ;;  %v1529_v36 = vld [vmem:[#allocation5 + $0x124] ss:$16 sps:$4 sm:$0xff]   ;;  %v1531_v37 = vld [vmem:[#allocation5 + $0x12c] ss:$16 sps:$4 sm:$0xff]  }
  0x77   : > { %v1533_v38 = vld [vmem:[#allocation5 + $0x120] ss:$16 sps:$4 sm:$0xff]   ;;  %v1534_v39 = vld [vmem:[#allocation5 + $0x128] ss:$16 sps:$4 sm:$0xff]   ;;  %v1535_v40 = vld [vmem:[#allocation5 + $0x144] ss:$16 sps:$4 sm:$0xff]  }
  0x78   : > { %759 = vmatpush1.bf16.msra.mxu0 %v1497_v14  ;;  %802 = vmatpush1.bf16.msra.mxu1 %v1498_v15  ;;  %v1537_v41 = vld [vmem:[#allocation5 + $0x14c] ss:$16 sps:$4 sm:$0xff]   ;;  %v1539_v42 = vld [vmem:[#allocation5 + $0x140] ss:$16 sps:$4 sm:$0xff]   ;;  %v1540_v43 = vld [vmem:[#allocation5 + $0x148] ss:$16 sps:$4 sm:$0xff]  }
  0x79   : > { %760 = vmatprep.subr.bf16.mxu0 %v1499_v16  ;;  %803 = vmatprep.subr.bf16.mxu1 %v1501_v17  ;;  %v1541_v44 = vld [vmem:[#allocation5 + $0x164] ss:$16 sps:$4 sm:$0xff]   ;;  %v1543_v45 = vld [vmem:[#allocation5 + $0x16c] ss:$16 sps:$4 sm:$0xff]   ;;  %v1545_v47 = vld [vmem:[#allocation5 + $0x160] ss:$16 sps:$4 sm:$0xff]  }
  0x7a   : > { %v406_v46 = vld [vmem:[%s1983_s11 + $0x8] sm:$0xff]  ;;  %v408_v49 = vld [vmem:[%s1983_s11 + $0x18] sm:$0xff]  ;;  %v1547_v50 = vld [vmem:[#allocation5 + $0x184] ss:$16 sps:$4 sm:$0xff]   ;;  %s1252_s15 = sshll.u32 %s1979_s27, 4  ;;  %s1357_s17 = sshll.u32 %s1822_s22, 8 }
  0x7b   : > { %v1546_v48 = vld [vmem:[#allocation5 + $0x168] ss:$16 sps:$4 sm:$0xff]   ;;  %v410_v51 = vpack.c.bf16 %v408_v49, %v406_v46  ;;  %v1549_v52 = vld [vmem:[#allocation5 + $0x18c] ss:$16 sps:$4 sm:$0xff]   ;;  %v1551_v53 = vld [vmem:[#allocation5 + $0x180] ss:$16 sps:$4 sm:$0xff]   ;;  %s2010_s30 = scalar_lea.hbm %s2059_s5, %s1357_s17 }
  0x7c   : > { %761 = vmatpush1.bf16.msra.mxu0 %v1503_v18  ;;  %804 = vmatpush1.bf16.msra.mxu1 %v1504_v19  ;;  %v1552_v54 = vld [vmem:[#allocation5 + $0x188] ss:$16 sps:$4 sm:$0xff]   ;;  %v1553_v55 = vld [vmem:[#allocation5 + $0x1a4] ss:$16 sps:$4 sm:$0xff]   ;;  %v1555_v56 = vld [vmem:[#allocation5 + $0x1ac] ss:$16 sps:$4 sm:$0xff]  }
  0x7d   : > { %762 = vmatprep.subr.bf16.mxu0 %v1505_v20  ;;  %805 = vmatprep.subr.bf16.mxu1 %v1507_v21  ;;  %v1557_v57 = vld [vmem:[#allocation5 + $0x1a0] ss:$16 sps:$4 sm:$0xff]   ;;  %v1558_v58 = vld [vmem:[#allocation5 + $0x1a8] ss:$16 sps:$4 sm:$0xff]   ;;  %v1559_v59 = vld [vmem:[#allocation5 + $0x1c4] ss:$16 sps:$4 sm:$0xff]  }
  0x7e   : > { %784 = vmatprep.mubr.bf16.mxu0 %v410_v51  ;;  %827 = vmatprep.mubr.bf16.mxu1 %v410_v51  ;;  %v1561_v60 = vld [vmem:[#allocation5 + $0x1cc] ss:$16 sps:$4 sm:$0xff]   ;;  %v1563_v61 = vld [vmem:[#allocation5 + $0x1c0] ss:$16 sps:$4 sm:$0xff]   ;;  %v1564_v62 = vld [vmem:[#allocation5 + $0x1c8] ss:$16 sps:$4 sm:$0xff]  }
  0x7f   : > { %v1565_v63 = vld [vmem:[#allocation5 + $0x1e4] ss:$16 sps:$4 sm:$0xff]   ;;  %v1567_v0 = vld [vmem:[#allocation5 + $0x1ec] ss:$16 sps:$4 sm:$0xff]   ;;  %v1569_v1 = vld [vmem:[#allocation5 + $0x1e0] ss:$16 sps:$4 sm:$0xff]  }
  0x80   : > { %763 = vmatpush1.bf16.msra.mxu0 %v1509_v22  ;;  %806 = vmatpush1.bf16.msra.mxu1 %v1510_v23  ;;  %v1570_v2 = vld [vmem:[#allocation5 + $0x1e8] ss:$16 sps:$4 sm:$0xff]   ;;  %v405_v3 = vld [vmem:[%s1983_s11] sm:$0xff]  ;;  %v407_v4 = vld [vmem:[%s1983_s11 + $0x10] sm:$0xff]  ;;  %s272_s13 = scalar_lea.vmem [#allocation8], %s1252_s15  ;;  %s1134_s9 = scalar_lea.sflag [#allocation4], %s1979_s27 }
  0x81   : > { %764 = vmatprep.subr.bf16.mxu0 %v1511_v24  ;;  %807 = vmatprep.subr.bf16.mxu1 %v1513_v25  ;;  %v1571_v5 = vld [vmem:[#allocation7 + $0x40] sm:$0xff]   ;;  %v409_v8 = vpack.c.bf16 %v407_v4, %v405_v3  ;;  %v1575_v10 = vld [vmem:[#allocation7 + $0x48] sm:$0xff]   ;;  %v1579_v14 = vld [vmem:[#allocation7 + $0x50] sm:$0xff]   ;;  %s1147_s14 = sshll.u32 %s272_s13, 4  ;;  %p2073_p0 = scmp.ne.s32.totalorder %s2068_s8, 0  ;;  %s2005_s14 = int_to_ptr.vmem [resolvable:$true] %s1147_s14 }
  0x82   : > { %v1572_v6 = vld [vmem:[#allocation7 + $0xc0] sm:$0xff]   ;;  %v1576_v11 = vld [vmem:[#allocation7 + $0xc8] sm:$0xff]   ;;  %v1580_v15 = vld [vmem:[#allocation7 + $0xd0] sm:$0xff]   ;;  %s1689_s6 = scalar_lea.vmem %s2005_s14, 256  ;;  %s1768_s22 = smov [#allocation8]  }
  0x83   : > { %v1573_v7 = vld [vmem:[#allocation7] sm:$0xff]   ;;  %v1577_v12 = vld [vmem:[#allocation7 + $0x8] sm:$0xff]   ;;  %v1581_v16 = vld [vmem:[#allocation7 + $0x10] sm:$0xff]   ;;  %p1690_p11 = scmp.ne.s32.totalorder %s2005_s14, %s1689_s6  ;;  %s1693_s10 = sshll.u32 %s1768_s22, 4  ;;  %s1694_s10 = int_to_ptr.vmem [resolvable:$false] %s1693_s10 }
  0x84   : > { %765 = vmatpush1.bf16.msra.mxu0 %v1515_v26  ;;  %808 = vmatpush1.bf16.msra.mxu1 %v1516_v27  ;;  %v1574_v9 = vld [vmem:[#allocation7 + $0x80] sm:$0xff]   ;;  %v1578_v13 = vld [vmem:[#allocation7 + $0x88] sm:$0xff]   ;;  %v1582_v17 = vld [vmem:[#allocation7 + $0x90] sm:$0xff]   ;;  %s1695_s11 = scalar_lea.vmem %s1694_s10, 512  ;;  %p1696_p5 = scmp.lt.s32.totalorder %s2005_s14, %s1694_s10 }
  0x85   : > { %766 = vmatprep.subr.bf16.mxu0 %v1517_v28  ;;  %809 = vmatprep.subr.bf16.mxu1 %v1519_v29  ;;  %v1583_v18 = vld [vmem:[#allocation7 + $0x58] sm:$0xff]   ;;  %v1587_v22 = vld [vmem:[#allocation7 + $0x60] sm:$0xff]   ;;  %v1591_v26 = vld [vmem:[#allocation7 + $0x68] sm:$0xff]   ;;  %p1691_p2 = pnand %p1690_p11, %p2073_p0  ;;  %p1697_p9 = scmp.lt.s32.totalorder %s1695_s11, %s1689_s6 }
  0x86   : > { %v1584_v19 = vld [vmem:[#allocation7 + $0xd8] sm:$0xff]   ;;  %v1588_v23 = vld [vmem:[#allocation7 + $0xe0] sm:$0xff]   ;;  %v1592_v27 = vld [vmem:[#allocation7 + $0xe8] sm:$0xff]  }
  0x87   : > { %v1585_v20 = vld [vmem:[#allocation7 + $0x18] sm:$0xff]   ;;  %v1589_v24 = vld [vmem:[#allocation7 + $0x20] sm:$0xff]   ;;  %v1593_v28 = vld [vmem:[#allocation7 + $0x28] sm:$0xff]   ;;  %p1692_p3 = pneg %p1691_p2  ;;  %p1698_p12 = por %p1697_p9, %p1696_p5 }
  0x88   : > { %767 = vmatpush1.bf16.msra.mxu0 %v1521_v30  ;;  %810 = vmatpush1.bf16.msra.mxu1 %v1522_v31  ;;  %v1586_v21 = vld [vmem:[#allocation7 + $0x98] sm:$0xff]   ;;  %v1590_v25 = vld [vmem:[#allocation7 + $0xa0] sm:$0xff]   ;;  %v1594_v29 = vld [vmem:[#allocation7 + $0xa8] sm:$0xff]  }
  0x89   : > { %768 = vmatprep.subr.bf16.mxu0 %v1523_v32  ;;  %811 = vmatprep.subr.bf16.mxu1 %v1525_v33  ;;  %v1595_v30 = vld [vmem:[#allocation7 + $0x70] sm:$0xff]   ;;  %p1699_p1 = pnand %p1698_p12, %p1692_p3 }
  0x8a   : > { %v1596_v31 = vld [vmem:[#allocation7 + $0xf0] sm:$0xff]  }
  0x8b   : > { %v1597_v32 = vld [vmem:[#allocation7 + $0x30] sm:$0xff]  }
  0x8c   : > { %769 = vmatpush1.bf16.msra.mxu0 %v1527_v34  ;;  %812 = vmatpush1.bf16.msra.mxu1 %v1528_v35  ;;  %v1598_v33 = vld [vmem:[#allocation7 + $0xb0] sm:$0xff]   ;;  %v1599_v34 = vld [vmem:[#allocation7 + $0x78] sm:$0xff]  }
  0x8d   : > { %770 = vmatprep.subr.bf16.mxu0 %v1529_v36  ;;  %813 = vmatprep.subr.bf16.mxu1 %v1531_v37  ;;  %v1600_v35 = vld [vmem:[#allocation7 + $0xf8] sm:$0xff]  }
  0x8e   : > { %v1601_v36 = vld [vmem:[#allocation7 + $0x38] sm:$0xff]  }
  0x8f   : > { %v1602_v37 = vld [vmem:[#allocation7 + $0xb8] sm:$0xff]  }
  0x90   : > { %771 = vmatpush1.bf16.msra.mxu0 %v1533_v38  ;;  %814 = vmatpush1.bf16.msra.mxu1 %v1534_v39  ;;  %v412_v38 = vlaneseq }
  0x91   : > { %772 = vmatprep.subr.bf16.mxu0 %v1535_v40  ;;  %815 = vmatprep.subr.bf16.mxu1 %v1537_v41 }
  0x92   : > { %v413_v39 = vshrl.u32 %v412_v38, 7 }
  0x94   : > { %773 = vmatpush1.bf16.msra.mxu0 %v1539_v42  ;;  %816 = vmatpush1.bf16.msra.mxu1 %v1540_v43  ;;  %v414_v40 = vsub.s32 0, %v413_v39  ;;  %v422_v41 = vsub.s32 2, %v413_v39  ;;  %v404_v42 = vld [vmem:[%s2056_s2] sm:$0xf]  ;;  %v418_v43 = vsub.s32 1, %v413_v39 }
  0x95   : > { %774 = vmatprep.subr.bf16.mxu0 %v1541_v44  ;;  %817 = vmatprep.subr.bf16.mxu1 %v1543_v45  ;;  %v426_v44 = vsub.s32 3, %v413_v39 }
  0x96   : > { %v415_v45 = vrot.slane %v404_v42, %v414_v40  ;;  %v423_v46 = vrot.slane %v404_v42, %v422_v41 }
  0x98   : > { %775 = vmatpush1.bf16.msra.mxu0 %v1545_v47  ;;  %818 = vmatpush1.bf16.msra.mxu1 %v1546_v48  ;;  %v419_v47 = vrot.slane %v404_v42, %v418_v43  ;;  %v427_v48 = vrot.slane %v404_v42, %v426_v44 }
  0x99   : > { %776 = vmatprep.subr.bf16.mxu0 %v1547_v50  ;;  %819 = vmatprep.subr.bf16.mxu1 %v1549_v52 }
  0x9c   : > { %777 = vmatpush1.bf16.msra.mxu0 %v1551_v53  ;;  %820 = vmatpush1.bf16.msra.mxu1 %v1552_v54 }
  0x9d   : > { %778 = vmatprep.subr.bf16.mxu0 %v1553_v55  ;;  %821 = vmatprep.subr.bf16.mxu1 %v1555_v56 }
  0xa0   : > { %779 = vmatpush1.bf16.msra.mxu0 %v1557_v57  ;;  %822 = vmatpush1.bf16.msra.mxu1 %v1558_v58 }
  0xa1   : > { %780 = vmatprep.subr.bf16.mxu0 %v1559_v59  ;;  %823 = vmatprep.subr.bf16.mxu1 %v1561_v60 }
  0xa4   : > { %781 = vmatpush1.bf16.msra.mxu0 %v1563_v61  ;;  %824 = vmatpush1.bf16.msra.mxu1 %v1564_v62 }
  0xa5   : > { %782 = vmatprep.subr.bf16.mxu0 %v1565_v63  ;;  %825 = vmatprep.subr.bf16.mxu1 %v1567_v0 }
  0xa8   : > { %783 = vmatpush1.bf16.msra.mxu0 %v1569_v1  ;;  %826 = vmatpush1.bf16.msra.mxu1 %v1570_v2 }
  0xa9   : > { %1358 = vmatprep.subr.bf16.mxu0 %v1571_v5  ;;  %1380 = vmatprep.subr.bf16.mxu1 %v1572_v6 }
  0xab   : > { %785 = vmatmul.mubr.bf16.vlgmr.msra.gmra.mrb[0].mxu0 %v409_v8  ;;  %828 = vmatmul.mubr.bf16.vlgmr.msra.gmra.mrb[0].mxu1 %v409_v8 }
  0xac   : > { %1359 = vmatpush3.bf16.msra.mxu0 %v1573_v7  ;;  %1381 = vmatpush3.bf16.msra.mxu1 %v1574_v9 }
  0xad   : > { %1360 = vmatprep.subr.bf16.mxu0 %v1575_v10  ;;  %1382 = vmatprep.subr.bf16.mxu1 %v1576_v11 }
  0xb0   : > { %1361 = vmatpush3.bf16.msra.mxu0 %v1577_v12  ;;  %1383 = vmatpush3.bf16.msra.mxu1 %v1578_v13 }
  0xb1   : > { %1362 = vmatprep.subr.bf16.mxu0 %v1579_v14  ;;  %1384 = vmatprep.subr.bf16.mxu1 %v1580_v15  ;;  %v1317_v15 = vld [vmem:[%s2058_s4] ss:$0 sm:$0xff] }
  0xb4   : > { %1363 = vmatpush3.bf16.msra.mxu0 %v1581_v16  ;;  %1385 = vmatpush3.bf16.msra.mxu1 %v1582_v17 }
  0xb5   : > { %1364 = vmatprep.subr.bf16.mxu0 %v1583_v18  ;;  %1386 = vmatprep.subr.bf16.mxu1 %v1584_v19 }
  0xb8   : > { %1365 = vmatpush3.bf16.msra.mxu0 %v1585_v20  ;;  %1387 = vmatpush3.bf16.msra.mxu1 %v1586_v21 }
  0xb9   : > { %1366 = vmatprep.subr.bf16.mxu0 %v1587_v22  ;;  %1388 = vmatprep.subr.bf16.mxu1 %v1588_v23 }
  0xbc   : > { %1367 = vmatpush3.bf16.msra.mxu0 %v1589_v24  ;;  %1389 = vmatpush3.bf16.msra.mxu1 %v1590_v25 }
  0xbd   : > { %1368 = vmatprep.subr.bf16.mxu0 %v1591_v26  ;;  %1390 = vmatprep.subr.bf16.mxu1 %v1592_v27 }
  0xc0   : > { %1369 = vmatpush3.bf16.msra.mxu0 %v1593_v28  ;;  %1391 = vmatpush3.bf16.msra.mxu1 %v1594_v29 }
  0xc1   : > { %1370 = vmatprep.subr.bf16.mxu0 %v1595_v30  ;;  %1392 = vmatprep.subr.bf16.mxu1 %v1596_v31 }
  0xc4   : > { %1371 = vmatpush3.bf16.msra.mxu0 %v1597_v32  ;;  %1393 = vmatpush3.bf16.msra.mxu1 %v1598_v33 }
  0xc5   : > { %1372 = vmatprep.subr.bf16.mxu0 %v1599_v34  ;;  %1394 = vmatprep.subr.bf16.mxu1 %v1600_v35 }
  0xc8   : > { %1373 = vmatpush3.bf16.msra.mxu0 %v1601_v36  ;;  %1395 = vmatpush3.bf16.msra.mxu1 %v1602_v37 }
 0x17e   : > { %v786_v49 = vpop.f32.mrb[0].mxu0  ;;  %v829_v50 = vpop.f32.mrb[0].mxu1 }
 0x17f   : > { %v787_v51 = vadd.f32 %v786_v49, %v415_v45  ;;  %v830_v52 = vadd.f32 %v829_v50, %v423_v46  ;;  %v788_v53 = vpop.f32.mrb[1].mxu0  ;;  %v831_v54 = vpop.f32.mrb[1].mxu1 }
 0x180   : > { %v789_v55 = vadd.f32 %v788_v53, %v419_v47  ;;  %v832_v56 = vadd.f32 %v831_v54, %v427_v48  ;;  %v790_v57 = vpop.f32.mrb[2].mxu0  ;;  %v833_v58 = vpop.f32.mrb[2].mxu1 }
 0x181   : > { %v840_v59 = vmax.f32 %v830_v52, 0.0  ;;  %v791_v60 = vadd.f32 %v790_v57, %v415_v45  ;;  %v834_v61 = vadd.f32 %v833_v58, %v423_v46  ;;  %v792_v62 = vpop.f32.mrb[3].mxu0  ;;  %v835_v63 = vpop.f32.mrb[3].mxu1  ;;  %v838_v3 = vmax.f32 %v787_v51, 0.0 }
 0x182   : > { %v841_v0 = vmax.f32 %v832_v56, 0.0  ;;  %v793_v1 = vadd.f32 %v792_v62, %v419_v47  ;;  %v836_v2 = vadd.f32 %v835_v63, %v427_v48  ;;  %v839_v6 = vmax.f32 %v789_v55, 0.0 }
 0x183   : > { %v842_v4 = vmax.f32 %v791_v60, 0.0  ;;  %v844_v5 = vmax.f32 %v834_v61, 0.0 }
 0x184   : > { %v843_v7 = vmax.f32 %v793_v1, 0.0  ;;  %v845_v8 = vmax.f32 %v836_v2, 0.0 }
 0x185   : > { %v846_v9 = vpack.c.bf16 %v842_v4, %v838_v3  ;;  %v848_v10 = vpack.c.bf16 %v844_v5, %v840_v59 }
 0x186   : > { %v847_v11 = vpack.c.bf16 %v843_v7, %v839_v6  ;;  %v849_v12 = vpack.c.bf16 %v845_v8, %v841_v0 }
 0x188   : > { %1081 = vmatprep.mubr.bf16.mxu0 %v847_v11  ;;  %1122 = vmatprep.mubr.bf16.mxu1 %v849_v12 }
 0x189   : > { %1082 = vmatmul.mubr.bf16.vlgmr.msra.gmra.mrb[4].mxu0 %v846_v9  ;;  %1123 = vmatmul.mubr.bf16.vlgmr.msra.gmra.mrb[4].mxu1 %v848_v10 }
 0x25c   : > { %v1374_v13 = vpop.f32.mrb[4].mxu0  ;;  %v1396_v14 = vpop.f32.mrb[4].mxu1 }
 0x25d   : > { %v1375_v16 = vpop.f32.mrb[5].mxu0  ;;  %v1397_v17 = vpop.f32.mrb[5].mxu1 }
 0x25e   : > { %v1376_v18 = vadd.f32 %v1375_v16, %v1374_v13  ;;  %v1398_v19 = vadd.f32 %v1397_v17, %v1396_v14  ;;  %v1377_v20 = vpop.f32.mrb[6].mxu0  ;;  %v1399_v21 = vpop.f32.mrb[6].mxu1 }
 0x25f   : > { %v1378_v22 = vpop.f32.mrb[7].mxu0  ;;  %v1400_v23 = vpop.f32.mrb[7].mxu1 }
 0x260   : > { %v1084_v24 = vadd.f32 %v1376_v18, %v1317_v15  ;;  %v1379_v25 = vadd.f32 %v1378_v22, %v1377_v20  ;;  %v1401_v26 = vadd.f32 %v1400_v23, %v1399_v21 }
 0x262   : > { %v1125_v27 = vadd.f32 %v1398_v19, %v1084_v24  ;;  %v1087_v28 = vadd.f32 %v1379_v25, %v1317_v15 }
 0x264   : > { %1131 = vst [vmem:[%s272_s13] sm:$0xff] %v1125_v27  ;;  %v1128_v29 = vadd.f32 %v1401_v26, %v1087_v28 }
 0x266   : > { %1132 = vst [vmem:[%s272_s13 + $0x8] sm:$0xff] %v1128_v29 }
 0x267   : > { %1702 = shalt.err (!%p1699_p1)
}
 0x268   : > { %s1703_s24 = scalar_lea.hbm %s2010_s30, 256  ;;  %s1707_s16 = scalar_lea.hbm %s2059_s5, 512 }
 0x269   : > { %p1704_p13 = scmp.ne.s32.totalorder %s2010_s30, %s1703_s24  ;;  %p1708_p4 = scmp.lt.u32.totalorder %s2010_s30, %s2059_s5 }
 0x26a   : > { %p1709_p7 = scmp.lt.u32.totalorder %s1707_s16, %s1703_s24  ;;  %p1711_p11 = scmp.lt.u32.totalorder %s1703_s24, %s2010_s30 }
 0x26b   : > { %p1705_p6 = pnand %p1704_p13, %p2073_p0 }
 0x26c   : > { %p1710_p8 = por %p1709_p7, %p1708_p4 }
 0x26d   : > { %p1706_p10 = pneg %p1705_p6 }
 0x26e   : > { %p1712_p2 = por %p1711_p11, %p1710_p8 }
 0x270   : > { %p1713_p3 = pnand %p1712_p2, %p1706_p10 }
 0x272   : > { %1716 = shalt.err (!%p1713_p3)
}
 0x273   : > { %s1769_s17 = smov 128   ;;  %s1770_s29 = smov 8  }
 0x274   : > { %1412 = dma.vmem_to_hbm [thread:$0]  (%p2073_p0), %s2005_s14, 256, %s2010_s30, %s1134_s9, %s1769_s17, %s1769_s17, %s1770_s29  }
 0x275 PF: > { %s1162_s12 = sand.u32 1, %s1747_s18   ;;  %p2074_p5 = scmp.ne.s32.totalorder %s2064_s25, 0 }
 0x276   : > { %p2075_p9 = scmp.ge.s32.totalorder %s1759_s21, 2  ;;  %s1163_s6 = scalar_lea.sflag [#allocation4], %s1162_s12 }
 0x278   : > { %p1426_p12 = pnand %p2075_p9, %p2074_p5 }
 0x27a   : > { %1742 = dma.done.wait (!%p1426_p12), %s1163_s6, 256  }
 0x27b   : > { %1744 = vsyncadd (!%p1426_p12), %s1163_s6, 4294967040  ;;  %p19_p1 = scmp.ge.s32.totalorder %s1914_s23, 4   ;;  %s2076_s18 = smov %s1751_s19 }
 0x27c   : > { %s2077_s19 = smov %s1755_s20  ;;  %s2078_s20 = smov %s1923_s7 }
 0x27d   : > { %s2079_s21 = smov %s1914_s23  ;;  %21 = sbr.rel (!%p19_p1) target bundleno = 6 (0x6), region = 93 }
 0x284   :  { %1168 = vsyncpa [#allocation3], 1 }
 0x285   :  { %1170 = vsyncpa [#allocation3 + $0x1], 1 }
 0x286   :  { %1171 = vsyncpa [#allocation6], 1 }
 0x287   :  { %1172 = vsyncpa [#allocation4], 1 }
 0x288   :  { %1174 = vsyncpa [#allocation4 + $0x1], 1 }

</bundles_post_ra>
